<compile_context>
chip_gen: v6e
topology: v6e:2x2x1
jax: 0.10.0
libtpu: 0.0.40
codegen_flags: <defaults>
</compile_context>

<pallas_src>
import functools

import jax
import jax.numpy as jnp
from jax.experimental import pallas as pl
from jax.experimental.pallas import tpu as pltpu


def _ca_kernel(x_ref, w1_ref, b1_ref, w2_ref, b2_ref, o_ref, *, inv_hw):
    # x_ref: (NB, C, HWp) — NB batch rows, channels on sublanes, spatial lanes.
    x = x_ref[...]

    # AdaptiveAvgPool2d(1): zero-padded lanes contribute 0 to the sum, so we
    # divide by the true HW (baked in as a static constant).
    pooled = jnp.sum(x, axis=-1) * inv_hw                     # (NB, C)

    # Conv2d(C, 1, 1): per-batch scalar  y1[n] = sum_c w1[c]*pooled[n,c] + b1.
    # w1 is laid out (1, C) so no transpose is needed.
    y1 = jnp.sum(pooled * w1_ref[...], axis=-1, keepdims=True) + b1_ref[...]  # (NB, 1)
    y1 = jnp.maximum(y1, 0.0)                                 # ReLU

    # Conv2d(1, C, 1): y2[n, c] = w2[c] * y1[n] + b2[c]
    y2 = w2_ref[...] * y1 + b2_ref[...]                       # (NB, C)

    # Hardsigmoid: clamp(x/6 + 0.5, 0, 1)
    y2 = jnp.clip(y2 * (1.0 / 6.0) + 0.5, 0.0, 1.0)

    # x * y — broadcast the per-(n, c) gate over the spatial lanes.
    o_ref[...] = x * y2[:, :, None]


def ca_forward(x, w1, b1, w2, b2):
    """x: (N, C, H, W) float32. Returns (N, C, H, W)."""
    N, C, H, W = x.shape
    HW = H * W
    HWp = ((HW + 127) // 128) * 128          # lane-dense stores (multiple of 128)

    # Pick the batch-block size NB:
    #  - aim for >= ~512 KiB per block (pipeline overhead amortization),
    #  - at least 8 sublanes of real data (NB * C >= 8),
    #  - cap so 2x-double-buffered in+out blocks stay well under v7x's 64 MiB VMEM.
    bytes_per_n = C * HWp * 4
    nb = max((512 * 1024 + bytes_per_n - 1) // bytes_per_n,   # >= 512 KiB
             -(-8 // C))                                      # NB*C >= 8
    max_block_bytes = 10 * 1024 * 1024                        # ~4x < 40 MiB (v7x-safe)
    nb = min(nb, max(1, max_block_bytes // bytes_per_n))
    nb = max(1, min(nb, N))
    # NOTE: for huge feature maps (C*HWp*4 > max_block_bytes) a second grid axis
    # tiling HW with an accumulator scratch would be needed; not required here.

    n_blocks = -(-N // nb)
    Np = n_blocks * nb

    x_flat = x.reshape(N, C, HW)
    pad_n, pad_hw = Np - N, HWp - HW
    if pad_n or pad_hw:
        x_flat = jnp.pad(x_flat, ((0, pad_n), (0, 0), (0, pad_hw)))

    # Grid-invariant weights as small 2-D VMEM tiles (fetched once).
    w1_2d = w1.reshape(1, C)        # conv1 weight (out=1, in=C)
    b1_2d = b1.reshape(1, 1)
    w2_2d = w2.reshape(1, C)        # conv2 weight (out=C, in=1)
    b2_2d = b2.reshape(1, C)

    kernel = functools.partial(_ca_kernel, inv_hw=1.0 / HW)

    out = pl.pallas_call(
        kernel,
        out_shape=jax.ShapeDtypeStruct((Np, C, HWp), x.dtype),
        grid_spec=pltpu.PrefetchScalarGridSpec(
            num_scalar_prefetch=0,
            grid=(n_blocks,),
            in_specs=[
                pl.BlockSpec((nb, C, HWp), lambda n: (n, 0, 0)),
                pl.BlockSpec((1, C), lambda n: (0, 0)),
                pl.BlockSpec((1, 1), lambda n: (0, 0)),
                pl.BlockSpec((1, C), lambda n: (0, 0)),
                pl.BlockSpec((1, C), lambda n: (0, 0)),
            ],
            out_specs=pl.BlockSpec((nb, C, HWp), lambda n: (n, 0, 0)),
        ),
        compiler_params=pltpu.CompilerParams(
            dimension_semantics=("parallel",),      # shard batch blocks across TCs (v7x)
            vmem_limit_bytes=48 * 1024 * 1024,      # explicit budget, safe on 64 MiB v7x
        ),
    )(x_flat, w1_2d, b1_2d, w2_2d, b2_2d)

    out = out[:N, :, :HW]
    return out.reshape(N, C, H, W)


def ca_reference(x, w1, b1, w2, b2):
    """Pure-JAX reference mirroring the PyTorch module."""
    pooled = jnp.mean(x, axis=(2, 3), keepdims=True)            # (N, C, 1, 1)
    y1 = jnp.einsum("nchw,c->nhw", pooled, w1)[..., None] + b1  # (N, 1, 1, 1)
    y1 = jnp.maximum(y1, 0.0)
    y2 = y1 * w2[None, :, None, None] + b2[None, :, None, None]  # (N, C, 1, 1)
    y2 = jnp.clip(y2 / 6.0 + 0.5, 0.0, 1.0)
    return x * y2


if __name__ == "__main__":
    key = jax.random.PRNGKey(0)
    N, C, H, W = 2, 4, 16, 16

    k_x, k_w1, k_b1, k_w2, k_b2 = jax.random.split(key, 5)
    x = jax.random.normal(k_x, (N, C, H, W), dtype=jnp.float32)
    # Conv2d(channel, 1, kernel_size=1): weight (1, C, 1, 1) -> (C,), bias (1,)
    w1 = jax.random.normal(k_w1, (C,), dtype=jnp.float32) * 0.5
    b1 = jax.random.normal(k_b1, (1,), dtype=jnp.float32) * 0.1
    # Conv2d(1, channel, kernel_size=1): weight (C, 1, 1, 1) -> (C,), bias (C,)
    w2 = jax.random.normal(k_w2, (C,), dtype=jnp.float32) * 0.5
    b2 = jax.random.normal(k_b2, (C,), dtype=jnp.float32) * 0.1

    out = ca_forward(x, w1, b1, w2, b2)
    out = jax.block_until_ready(out)

    ref = ca_reference(x, w1, b1, w2, b2)
    assert out.shape == (N, C, H, W)
    assert jnp.allclose(out, ref, atol=1e-5, rtol=1e-5), "mismatch vs reference"

    print("KERNEL_OK")
</pallas_src>

<mosaic_0001>
module attributes {stable_mosaic.version = 11 : i64} {
  func.func @_ca_kernel(%arg0: i32, %arg1: memref<2x4x256xf32, #tpu.memory_space<vmem>>, %arg2: memref<1x4xf32, #tpu.memory_space<vmem>>, %arg3: memref<1x1xf32, #tpu.memory_space<vmem>>, %arg4: memref<1x4xf32, #tpu.memory_space<vmem>>, %arg5: memref<1x4xf32, #tpu.memory_space<vmem>>, %arg6: memref<2x4x256xf32, #tpu.memory_space<vmem>>) attributes {dimension_semantics = [#tpu.dimension_semantics<parallel>], iteration_bounds = array<i64: 1>, scalar_prefetch = 0 : i64, scratch_operands = 0 : i64, tpu.core_type = #tpu.core_type<tc>, window_params = [{transform_indices = @transform_0, window_bounds = array<i64: 2, 4, 256>}, {pipeline_mode = #tpu.pipeline_mode<synchronous>, transform_indices = @transform_1, window_bounds = array<i64: 1, 4>}, {pipeline_mode = #tpu.pipeline_mode<synchronous>, transform_indices = @transform_2, window_bounds = array<i64: 1, 1>}, {pipeline_mode = #tpu.pipeline_mode<synchronous>, transform_indices = @transform_3, window_bounds = array<i64: 1, 4>}, {pipeline_mode = #tpu.pipeline_mode<synchronous>, transform_indices = @transform_4, window_bounds = array<i64: 1, 4>}, {transform_indices = @transform_5, window_bounds = array<i64: 2, 4, 256>}]} {
    %c0 = arith.constant 0 : index
    %c0_0 = arith.constant 0 : index
    %c0_1 = arith.constant 0 : index
    %0 = vector.load %arg1[%c0, %c0_0, %c0_1] : memref<2x4x256xf32, #tpu.memory_space<vmem>>, vector<2x4x256xf32>
    %cst = arith.constant dense<0.000000e+00> : vector<2x4xf32>
    %1 = vector.multi_reduction <add>, %0, %cst [2] : vector<2x4x256xf32> to vector<2x4xf32>
    %cst_2 = arith.constant 3.906250e-03 : f32
    %2 = vector.broadcast %cst_2 : f32 to vector<2x4xf32>
    %3 = arith.mulf %1, %2 : vector<2x4xf32>
    %c0_3 = arith.constant 0 : index
    %c0_4 = arith.constant 0 : index
    %4 = vector.load %arg2[%c0_3, %c0_4] : memref<1x4xf32, #tpu.memory_space<vmem>>, vector<1x4xf32>
    %5 = vector.broadcast %4 : vector<1x4xf32> to vector<2x4xf32>
    %6 = arith.mulf %3, %5 : vector<2x4xf32>
    %cst_5 = arith.constant dense<0.000000e+00> : vector<2xf32>
    %7 = vector.multi_reduction <add>, %6, %cst_5 [1] : vector<2x4xf32> to vector<2xf32>
    %8 = vector.shape_cast %7 : vector<2xf32> to vector<2x1xf32>
    %c0_6 = arith.constant 0 : index
    %c0_7 = arith.constant 0 : index
    %9 = vector.load %arg3[%c0_6, %c0_7] : memref<1x1xf32, #tpu.memory_space<vmem>>, vector<1x1xf32>
    %10 = vector.broadcast %9 : vector<1x1xf32> to vector<2x1xf32>
    %11 = arith.addf %8, %10 : vector<2x1xf32>
    %cst_8 = arith.constant 0.000000e+00 : f32
    %12 = vector.broadcast %cst_8 : f32 to vector<2x1xf32>
    %13 = arith.maximumf %11, %12 : vector<2x1xf32>
    %c0_9 = arith.constant 0 : index
    %c0_10 = arith.constant 0 : index
    %14 = vector.load %arg4[%c0_9, %c0_10] : memref<1x4xf32, #tpu.memory_space<vmem>>, vector<1x4xf32>
    %15 = vector.broadcast %14 : vector<1x4xf32> to vector<2x4xf32>
    %16 = vector.broadcast %13 : vector<2x1xf32> to vector<2x4xf32>
    %17 = arith.mulf %15, %16 : vector<2x4xf32>
    %c0_11 = arith.constant 0 : index
    %c0_12 = arith.constant 0 : index
    %18 = vector.load %arg5[%c0_11, %c0_12] : memref<1x4xf32, #tpu.memory_space<vmem>>, vector<1x4xf32>
    %19 = vector.broadcast %18 : vector<1x4xf32> to vector<2x4xf32>
    %20 = arith.addf %17, %19 : vector<2x4xf32>
    %cst_13 = arith.constant 0.166666672 : f32
    %21 = vector.broadcast %cst_13 : f32 to vector<2x4xf32>
    %22 = arith.mulf %20, %21 : vector<2x4xf32>
    %cst_14 = arith.constant 5.000000e-01 : f32
    %23 = vector.broadcast %cst_14 : f32 to vector<2x4xf32>
    %24 = arith.addf %22, %23 : vector<2x4xf32>
    %cst_15 = arith.constant 0.000000e+00 : f32
    %cst_16 = arith.constant 1.000000e+00 : f32
    %25 = vector.broadcast %cst_15 : f32 to vector<2x4xf32>
    %26 = arith.maximumf %25, %24 : vector<2x4xf32>
    %27 = vector.broadcast %cst_16 : f32 to vector<2x4xf32>
    %28 = arith.minimumf %27, %26 : vector<2x4xf32>
    %29 = vector.shape_cast %28 : vector<2x4xf32> to vector<2x4x1xf32>
    %30 = vector.broadcast %29 : vector<2x4x1xf32> to vector<2x4x256xf32>
    %31 = arith.mulf %0, %30 : vector<2x4x256xf32>
    %c0_17 = arith.constant 0 : index
    %c0_18 = arith.constant 0 : index
    %c0_19 = arith.constant 0 : index
    %32 = vector.load %arg6[%c0_17, %c0_18, %c0_19] : memref<2x4x256xf32, #tpu.memory_space<vmem>>, vector<2x4x256xf32>
    tpu.vector_store %arg6[%c0_17, %c0_18, %c0_19], %31 {strides = array<i32>} : memref<2x4x256xf32, #tpu.memory_space<vmem>>, vector<2x4x256xf32>,
    return
  }
  func.func @transform_0(%arg0: i32) -> (i32, i32, i32) {
    %c0_i32 = arith.constant 0 : i32
    %c0_i32_0 = arith.constant 0 : i32
    %c0_i32_1 = arith.constant 0 : i32
    return %arg0, %c0_i32, %c0_i32_0 : i32, i32, i32
  }
  func.func @transform_1(%arg0: i32) -> (i32, i32) {
    %c0_i32 = arith.constant 0 : i32
    %c0_i32_0 = arith.constant 0 : i32
    %c0_i32_1 = arith.constant 0 : i32
    return %c0_i32, %c0_i32_0 : i32, i32
  }
  func.func @transform_2(%arg0: i32) -> (i32, i32) {
    %c0_i32 = arith.constant 0 : i32
    %c0_i32_0 = arith.constant 0 : i32
    %c0_i32_1 = arith.constant 0 : i32
    return %c0_i32, %c0_i32_0 : i32, i32
  }
  func.func @transform_3(%arg0: i32) -> (i32, i32) {
    %c0_i32 = arith.constant 0 : i32
    %c0_i32_0 = arith.constant 0 : i32
    %c0_i32_1 = arith.constant 0 : i32
    return %c0_i32, %c0_i32_0 : i32, i32
  }
  func.func @transform_4(%arg0: i32) -> (i32, i32) {
    %c0_i32 = arith.constant 0 : i32
    %c0_i32_0 = arith.constant 0 : i32
    %c0_i32_1 = arith.constant 0 : i32
    return %c0_i32, %c0_i32_0 : i32, i32
  }
  func.func @transform_5(%arg0: i32) -> (i32, i32, i32) {
    %c0_i32 = arith.constant 0 : i32
    %c0_i32_0 = arith.constant 0 : i32
    %c0_i32_1 = arith.constant 0 : i32
    return %arg0, %c0_i32, %c0_i32_0 : i32, i32, i32
  }
}

</mosaic_0001>

<bundles_post_ra>
// kernel: tpu_custom_call.1
= control target key start
LH: loop header
LB: loop body
LE: loop exit
PB: predicated region body
PF: predicated region fallthrough
CT: control target
= control target key end

     0   :  { %s312_s0 = inlined_call_operand.hbm [shape: f32[2,4,256], index: 0, kind: input, shape index: {}]   ;;  %s313_s1 = inlined_call_operand.vmem [shape: f32[1,4], index: 1, kind: input, shape index: {}]   ;;  %s314_s2 = inlined_call_operand.<no memory space> [shape: f32[1,1], index: 2, kind: input, shape index: {}]   ;;  %s315_s3 = inlined_call_operand.vmem [shape: f32[1,4], index: 3, kind: input, shape index: {}]   ;;  %s316_s4 = inlined_call_operand.vmem [shape: f32[1,4], index: 4, kind: input, shape index: {}]   ;;  %s317_s5 = inlined_call_operand.hbm [shape: f32[2,4,256], index: 5, kind: output, shape index: {}]  }
   0x1   :  { %v10_v0 = vstv %s314_s2 }
   0x2   :  { %11 = vst [vmem:[#allocation2] sm:$0x1] %v10_v0 }
   0x3   :  { %12 = vsyncpa [#allocation4], 0 }
   0x4   :  { %13 = vsyncpa [#allocation5], 0  ;;  %s240_s20 = smov [#allocation3]  }
   0x5   :  { %s19_s21 = sshll.u32 %s240_s20, 4  ;;  %s20_s21 = int_to_ptr.vmem [resolvable:$true] %s19_s21 }
   0x6   :  { %s204_s22 = scalar_lea.vmem %s20_s21, 256  ;;  %p209_p1 = scmp.lt.s32.totalorder %s20_s21, %s20_s21 }
   0x7   :  { %p205_p0 = scmp.ne.s32.totalorder %s20_s21, %s204_s22  ;;  %p210_p2 = scmp.lt.s32.totalorder %s204_s22, %s204_s22 }
   0x9   :  { %p211_p3 = por %p210_p2, %p209_p1 }
   0xb   :  { %p212_p4 = pnand %p211_p3, %p205_p0 }
   0xd   :  { %215 = shalt.err (!%p212_p4)
}
   0xe   :  { %s241_s23 = smov 128   ;;  %s242_s24 = smov 8  }
   0xf   :  { %25 = dma.hbm_to_vmem [thread:$0]  %s312_s0, 256, %s20_s21, [#allocation4], %s241_s23, %s241_s23, %s242_s24  }
  0x10   :  { %236 = dma.done.wait [#allocation4], 256  }
  0x11   :  { %237 = vsyncadd [#allocation4], 4294967040  ;;  %vm45_vm0 = vcmask 1043456   ;;  %v285_v1 = vld [vmem:[#allocation3] sm:$0xff]  ;;  %v287_v2 = vld [vmem:[#allocation3 + $0x8] sm:$0xff]  ;;  %v243_v12 = vmov 0   ;;  %v78_v20 = vlaneseq }
  0x12   :  { %v182_v3 = vld [vmem:[%s313_s1] ss:$0 sm:$0xff]  ;;  %v41_v4 = vcombine.high %v285_v1, %v285_v1  ;;  %v46_v5 = vsel %vm45_vm0, %v285_v1, 0.0  ;;  %v42_v6 = vcombine.high %v287_v2, %v287_v2  ;;  %v51_v8 = vsel %vm45_vm0, %v287_v2, 0.0  ;;  %192 = vset.pattern.permute.xlu1 %v243_v12  ;;  %193 = vset.pattern.permute.xlu0 %v243_v12 }
  0x13   :  { %65 = vbcast.lane.b32.xlu1 %v182_v3, 256  ;;  %v79_v21 = vand.u32 127, %v78_v20  ;;  %v81_v22 = vshrl.u32 %v78_v20, 7  ;;  %vm88_vm1 = vcmask 1041409   ;;  %vm91_vm2 = vcmask 25600  }
  0x14   :  { %v47_v7 = vsel %vm45_vm0, %v41_v4, 0.0  ;;  %v52_v9 = vsel %vm45_vm0, %v42_v6, 0.0  ;;  %v183_v30 = vld [vmem:[#allocation2] ss:$0 sm:$0xff]  ;;  %v244_v47 = vmov 839922192  }
  0x15   :  { %v48_v10 = vadd.f32 %v47_v7, %v46_v5  ;;  %v53_v11 = vadd.f32 %v52_v9, %v51_v8  ;;  %v82_v23 = vsub.s32 %v79_v21, %v81_v22  ;;  %v184_v34 = vld [vmem:[%s315_s3] ss:$0 sm:$0xff]  ;;  %v131_v42 = vsub.s32 0, %v81_v22  ;;  %s245_s3 = smov [#allocation6]  }
  0x16   :  { %v185_v35 = vld [vmem:[%s316_s4] ss:$0 sm:$0xff]  ;;  %v138_v45 = vsub.s32 1, %v81_v22  ;;  %v146_v48 = vunpack.c.l.s4 %v244_v47  ;;  %s170_s4 = sshll.u32 %s245_s3, 4  ;;  %s171_s4 = int_to_ptr.vmem [resolvable:$true] %s170_s4 }
  0x17   :  { %49 = vadd.xlane.f32.xlu0 %v48_v10  ;;  %s216_s30 = scalar_lea.vmem %s171_s4, 256  ;;  %p221_p6 = scmp.lt.s32.totalorder %s171_s4, %s171_s4 }
  0x18   :  { %v147_v49 = vunpack.c.0.s8 %v146_v48  ;;  %p217_p5 = scmp.ne.s32.totalorder %s171_s4, %s216_s30  ;;  %p222_p7 = scmp.lt.s32.totalorder %s216_s30, %s216_s30 }
  0x1a   :  { %v150_v50 = vsub.s32 %v147_v49, %v81_v22  ;;  %p223_p8 = por %p222_p7, %p221_p6 }
  0x1b   :  { %54 = vadd.xlane.f32.xlu0 %v53_v11 }
  0x1c   :  { %p224_p9 = pnand %p223_p8, %p217_p5 }
  0x85   :  { %v66_v14 = vpop.permute.xlu1 %65 }
  0xa0   :  { %v50_v13 = vpop.xlane.xlu0 %49 }
  0xa1   :  { %v56_v15 = vmul.f32 0.00390625, %v50_v13 }
  0xa3   :  { %v68_v16 = vmul.f32 %v66_v14, %v56_v15 }
  0xa4   :  { %v55_v17 = vpop.xlane.xlu0 %54 }
  0xa5   :  { %v57_v18 = vmul.f32 0.00390625, %v55_v17  ;;  %73 = vperm.xlu1 %192, %v68_v16  }
  0xa7   :  { %v69_v19 = vmul.f32 %v66_v14, %v57_v18 }
  0xa9   :  { %76 = vperm.xlu0 %193, %v69_v19  }
 0x120   :  { %v74_v24 = vpop.permute.xlu1 %73 }
 0x121   :  { %v83_v26 = vrot.slane %v74_v24, %v82_v23 }
 0x124   :  { %v77_v25 = vpop.permute.xlu0 %76 }
 0x125   :  { %v87_v27 = vrot.slane %v77_v25, %v82_v23 }
 0x127   :  { %v89_v28 = vsel %vm88_vm1, %v87_v27, %v83_v26 }
 0x128   :  { %v92_v29 = vsel %vm91_vm2, %v89_v28, 0.0 }
 0x129   :  { %93 = vadd.xlane.f32.xlu1 %v92_v29 }
 0x1b2   :  { %v94_v31 = vpop.xlane.xlu1 %93 }
 0x1b3   :  { %v102_v32 = vadd.f32 %v183_v30, %v94_v31 }
 0x1b5   :  { %v103_v33 = vmax.f32 %v102_v32, 0.0 }
 0x1b7   :  { %113 = vperm.xlu1 %192, %v103_v33  }
 0x232   :  { %v114_v36 = vpop.permute.xlu1 %113 }
 0x233   :  { %v116_v37 = vmul.f32 %v184_v34, %v114_v36 }
 0x235   :  { %v124_v38 = vadd.f32 %v185_v35, %v116_v37 }
 0x237   :  { %v125_v39 = vmul.f32 0.16666667, %v124_v38 }
 0x239   :  { %v126_v40 = vadd.f32 0.5, %v125_v39 }
 0x23b   :  { %v127_v41 = vmax.f32 %v126_v40, 0.0 }
 0x23d   :  { %v128_v43 = vmin.f32 %v127_v41, 1.0 }
 0x23f   :  { %v132_v44 = vrot.slane %v128_v43, %v131_v42  ;;  %v139_v46 = vrot.slane %v128_v43, %v138_v45 }
 0x241   :  { %134 = vbcast.lane.b32.xlu0 %v132_v44, 256 }
 0x245   :  { %141 = vbcast.lane.b32.xlu0 %v139_v46, 256 }
 0x2b3   :  { %v135_v51 = vpop.permute.xlu0 %134 }
 0x2b4   :  { %v151_v52 = vrot.slane %v135_v51, %v150_v50 }
 0x2b6   :  { %v161_v53 = vmul.f32 %v151_v52, %v285_v1 }
 0x2b7   :  { %v142_v54 = vpop.permute.xlu0 %141 }
 0x2b8   :  { %163 = vst [vmem:[#allocation6] sm:$0xff] %v161_v53  ;;  %v158_v55 = vrot.slane %v142_v54, %v150_v50 }
 0x2ba   :  { %v162_v56 = vmul.f32 %v158_v55, %v287_v2 }
 0x2bc   :  { %164 = vst [vmem:[#allocation6 + $0x8] sm:$0xff] %v162_v56 }
 0x2bd   :  { %227 = shalt.err (!%p224_p9)
}
 0x2be   :  { %176 = dma.vmem_to_hbm [thread:$0]  %s171_s4, 256, %s317_s5, [#allocation5], %s241_s23, %s241_s23, %s242_s24  }
 0x2bf   :  { %238 = dma.done.wait [#allocation5], 256  }
 0x2c0   :  { %239 = vsyncadd [#allocation5], 4294967040 }
 0x2c1   :  { %180 = vsyncpa [#allocation4], 1 }
 0x2c2   :  { %181 = vsyncpa [#allocation5], 1 }

</bundles_post_ra>
